<compile_context>
chip_gen: v7x
topology: tpu7x:2x2x1
jax: 0.10.0
libtpu: 0.0.40
codegen_flags: <defaults>
</compile_context>

<pallas_src>
import jax
import jax.numpy as jnp
from jax.experimental import pallas as pl
from jax.experimental.pallas import tpu as pltpu

LANE = 128          # TPU lane width; output feature dim is padded up to this.
DEFAULT_TB = 128    # Batch tile: multiple of 128 -> full MXU rows on v5e/v6e/v7x.


def fused_linear_kernel(x_ref, w_ref, b_ref, o_ref):
    """One batch tile of: out = x @ W + b (W already fused & pre-transposed).

    x_ref: (TB, D_in)    bf16
    w_ref: (D_in, O_pad) bf16  (VMEM-resident across all batch tiles)
    b_ref: (1, O_pad)    f32   (VMEM-resident across all batch tiles)
    o_ref: (TB, O_pad)   f32   (lane-dense store)
    """
    o_ref[...] = (
        jnp.dot(x_ref[...], w_ref[...], preferred_element_type=jnp.float32)
        + b_ref[...]
    )


def prepare_fused_params(w1, b1, w2, b2):
    """One-time parameter prep (NOT per forward call).

    Fuses Linear(w1,b1) followed by Linear(w2,b2) (no activation in between, so
    this is mathematically exact), pre-transposes to (D_in, O) so the kernel
    does a plain (M,K)@(K,N) contraction, pads O up to a 128-lane multiple, and
    casts the weight to bf16 (bias stays f32, added post-accumulation).
    """
    d_in = w1.shape[1]
    out_dim = w2.shape[0]
    o_pad = max(LANE, ((out_dim + LANE - 1) // LANE) * LANE)

    w_fused = w1.T @ w2.T          # (D_in, O)
    b_fused = b1 @ w2.T + b2       # (O,)

    w_pad = jnp.zeros((d_in, o_pad), jnp.float32).at[:, :out_dim].set(w_fused)
    b_pad = jnp.zeros((1, o_pad), jnp.float32).at[:, :out_dim].set(b_fused)
    return w_pad.astype(jnp.bfloat16), b_pad, out_dim


def fashion_mnist_model_v0(x_nchw, w_fused, b_fused, out_dim, tb=DEFAULT_TB):
    """Forward pass of FashionMNISTModelV0 with pre-fused parameters.

    x_nchw: (B, C, H, W) float32; returns (B, out_dim) float32.
    """
    B = x_nchw.shape[0]
    d_in = 1
    for s in x_nchw.shape[1:]:
        d_in *= s
    assert d_in == w_fused.shape[0]
    o_pad = w_fused.shape[1]

    # nn.Flatten (row-major, identical to torch) + bf16 feed for the MXU.
    x = x_nchw.reshape(B, d_in).astype(jnp.bfloat16)

    # Batch tiling: tiny batches run as one full-extent tile; otherwise pad B up
    # to a multiple of tb so the grid is exact.
    if B <= tb:
        tb_eff, b_padded = B, B
    else:
        tb_eff = tb
        b_padded = ((B + tb - 1) // tb) * tb
        if b_padded != B:
            x = jnp.pad(x, ((0, b_padded - B), (0, 0)))

    grid = (b_padded // tb_eff,)

    out = pl.pallas_call(
        fused_linear_kernel,
        out_shape=jax.ShapeDtypeStruct((b_padded, o_pad), jnp.float32),
        grid=grid,
        in_specs=[
            pl.BlockSpec((tb_eff, d_in), lambda i: (i, 0)),   # batch-tiled activations
            pl.BlockSpec((d_in, o_pad), lambda i: (0, 0)),    # fused weight, VMEM-resident
            pl.BlockSpec((1, o_pad), lambda i: (0, 0)),       # fused bias, VMEM-resident
        ],
        out_specs=pl.BlockSpec((tb_eff, o_pad), lambda i: (i, 0)),
        compiler_params=pltpu.CompilerParams(
            # Independent batch tiles: v7x's two TensorCores split the grid;
            # harmless serial loop on v5e/v6e (single TC).
            dimension_semantics=("parallel",),
            # Footprint here is < 1 MiB; kept explicit so scaled-up batch tiles
            # are budgeted against v7x's 64 MiB VMEM, not v5e/v6e's 128 MiB.
            vmem_limit_bytes=32 * 1024 * 1024,
        ),
    )(x, w_fused, b_fused)

    return out[:B, :out_dim]


if __name__ == "__main__":
    # FashionMNIST-like sizes: 28x28 grayscale images, 32 hidden units, 10 classes.
    B, C, H, W = 256, 1, 28, 28
    input_shape = C * H * W          # 784
    hidden_units = 32
    output_shape = 10

    key = jax.random.PRNGKey(0)
    kx, kw1, kb1, kw2, kb2 = jax.random.split(key, 5)

    x = jax.random.normal(kx, (B, C, H, W), dtype=jnp.float32)

    # PyTorch nn.Linear-style uniform init with bound 1/sqrt(fan_in).
    bound1 = 1.0 / (input_shape ** 0.5)
    w1 = jax.random.uniform(kw1, (hidden_units, input_shape), jnp.float32, -bound1, bound1)
    b1 = jax.random.uniform(kb1, (hidden_units,), jnp.float32, -bound1, bound1)
    bound2 = 1.0 / (hidden_units ** 0.5)
    w2 = jax.random.uniform(kw2, (output_shape, hidden_units), jnp.float32, -bound2, bound2)
    b2 = jax.random.uniform(kb2, (output_shape,), jnp.float32, -bound2, bound2)

    # One-time parameter prep (fusion + transpose + lane padding + bf16 cast).
    w_fused, b_fused, out_dim = prepare_fused_params(w1, b1, w2, b2)

    out = fashion_mnist_model_v0(x, w_fused, b_fused, out_dim)
    out = jax.block_until_ready(out)
    assert out.shape == (B, output_shape)

    x_flat = x.reshape(B, -1)

    # Reference 1: full-f32 PyTorch-equivalent math (Flatten -> Linear -> Linear).
    ref_f32 = (x_flat @ w1.T + b1) @ w2.T + b2
    assert jnp.allclose(out, ref_f32, atol=5e-2, rtol=5e-2), float(
        jnp.max(jnp.abs(out - ref_f32)))

    # Reference 2: identical bf16-prepped math in plain JAX (tight tolerance).
    ref_bf16 = (
        jnp.dot(x_flat.astype(jnp.bfloat16), w_fused,
                preferred_element_type=jnp.float32) + b_fused
    )[:, :out_dim]
    assert jnp.allclose(out, ref_bf16, atol=1e-2, rtol=1e-2), float(
        jnp.max(jnp.abs(out - ref_bf16)))

    print("KERNEL_OK")
</pallas_src>

<mosaic_0001>
module attributes {stable_mosaic.version = 11 : i64} {
  func.func @fused_linear_kernel(%arg0: i32, %arg1: memref<128x784xbf16, #tpu.memory_space<vmem>>, %arg2: memref<784x128xbf16, #tpu.memory_space<vmem>>, %arg3: memref<1x128xf32, #tpu.memory_space<vmem>>, %arg4: memref<128x128xf32, #tpu.memory_space<vmem>>) attributes {dimension_semantics = [#tpu.dimension_semantics<parallel>], iteration_bounds = array<i64: 2>, scalar_prefetch = 0 : i64, scratch_operands = 0 : i64, tpu.core_type = #tpu.core_type<tc>, window_params = [{transform_indices = @transform_0, window_bounds = array<i64: 128, 784>}, {pipeline_mode = #tpu.pipeline_mode<synchronous>, transform_indices = @transform_1, window_bounds = array<i64: 784, 128>}, {pipeline_mode = #tpu.pipeline_mode<synchronous>, transform_indices = @transform_2, window_bounds = array<i64: 1, 128>}, {transform_indices = @transform_3, window_bounds = array<i64: 128, 128>}]} {
    %c0 = arith.constant 0 : index
    %c0_0 = arith.constant 0 : index
    %0 = vector.load %arg1[%c0, %c0_0] : memref<128x784xbf16, #tpu.memory_space<vmem>>, vector<128x784xbf16>
    %c0_1 = arith.constant 0 : index
    %c0_2 = arith.constant 0 : index
    %1 = vector.load %arg2[%c0_1, %c0_2] : memref<784x128xbf16, #tpu.memory_space<vmem>>, vector<784x128xbf16>
    %cst = arith.constant dense<0.000000e+00> : vector<128x128xf32>
    %2 = tpu.matmul %0, %1, %cst {dimension_numbers = #tpu.dot_dimension_numbers<[1], [0], [0], [1], [0, 0, 1, 1], [], []>} : vector<128x784xbf16>, vector<784x128xbf16>, vector<128x128xf32> -> vector<128x128xf32>
    %c0_3 = arith.constant 0 : index
    %c0_4 = arith.constant 0 : index
    %3 = vector.load %arg3[%c0_3, %c0_4] : memref<1x128xf32, #tpu.memory_space<vmem>>, vector<1x128xf32>
    %4 = vector.broadcast %3 : vector<1x128xf32> to vector<128x128xf32>
    %5 = arith.addf %2, %4 : vector<128x128xf32>
    %c0_5 = arith.constant 0 : index
    %c0_6 = arith.constant 0 : index
    %6 = vector.load %arg4[%c0_5, %c0_6] : memref<128x128xf32, #tpu.memory_space<vmem>>, vector<128x128xf32>
    tpu.vector_store %arg4[%c0_5, %c0_6], %5 {strides = array<i32>} : memref<128x128xf32, #tpu.memory_space<vmem>>, vector<128x128xf32>,
    return
  }
  func.func @transform_0(%arg0: i32) -> (i32, i32) {
    %c0_i32 = arith.constant 0 : i32
    %c0_i32_0 = arith.constant 0 : i32
    return %arg0, %c0_i32 : i32, i32
  }
  func.func @transform_1(%arg0: i32) -> (i32, i32) {
    %c0_i32 = arith.constant 0 : i32
    %c0_i32_0 = arith.constant 0 : i32
    %c0_i32_1 = arith.constant 0 : i32
    return %c0_i32, %c0_i32_0 : i32, i32
  }
  func.func @transform_2(%arg0: i32) -> (i32, i32) {
    %c0_i32 = arith.constant 0 : i32
    %c0_i32_0 = arith.constant 0 : i32
    %c0_i32_1 = arith.constant 0 : i32
    return %c0_i32, %c0_i32_0 : i32, i32
  }
  func.func @transform_3(%arg0: i32) -> (i32, i32) {
    %c0_i32 = arith.constant 0 : i32
    %c0_i32_0 = arith.constant 0 : i32
    return %arg0, %c0_i32 : i32, i32
  }
}

</mosaic_0001>

<bundles_post_ra>
// kernel: tpu_custom_call.1
= control target key start
LH: loop header
LB: loop body
LE: loop exit
PB: predicated region body
PF: predicated region fallthrough
CT: control target
= control target key end

     0   :  { %8 = vsyncpa [#allocation3], 0  ;;  %s2451_s0 = inlined_call_operand.vmem [shape: bf16[256,784], index: 0, kind: input, shape index: {}]   ;;  %s2452_s1 = inlined_call_operand.vmem [shape: bf16[784,128], index: 1, kind: input, shape index: {}]   ;;  %s2453_s2 = inlined_call_operand.vmem [shape: f32[1,128], index: 2, kind: input, shape index: {}]   ;;  %s2454_s3 = inlined_call_operand.hbm [shape: f32[256,128], index: 3, kind: output, shape index: {}]  }
   0x1   :  { %10 = vsyncpa [#allocation3 + $0x1], 0  ;;  %s2044_s12 = smov 0   ;;  %s2046_s13 = smov 0  }
   0x2   :  { %s2048_s14 = smov 0   ;;  %s2050_s15 = smov 0  }
   0x3 LB: > { %s2065_s16 = sadd.s32 4294967295, %s2019_s15   ;;  %s1424_s17 = sadd.s32 4294967294, %s2019_s15   ;;  %s2019_s15 = sphi %s2050_s15, %s2460_s15   ;;  %s2015_s14 = sphi %s2048_s14, %s2459_s14   ;;  %s2011_s13 = sphi %s2046_s13, %s2458_s13   ;;  %s2007_s12 = sphi %s2044_s12, %s2457_s12  }
   0x4   : > { %s2069_s18 = sadd.s32 1, %s2019_s15   ;;  %s91_s19 = sadd.s32 1, %s2015_s14 }
   0x5   : > { %s88_s20 = ssub.s32 %s2019_s15, %s2069_s18  ;;  %p101_p0 = scmp.ne.s32.totalorder %s2015_s14, %s2011_s13 }
   0x6   : > { %p89_p1 = scmp.eq.s32.totalorder %s88_s20, 0  ;;  %p102_p2 = scmp.eq.s32.totalorder %s2065_s16, 1 }
   0x7   : > { %p107_p3 = scmp.ne.s32.totalorder %s2011_s13, %s2007_s12  ;;  %p108_p4 = scmp.eq.s32.totalorder %s1424_s17, 1 }
   0x8   : > { %s2080_s21 = scalar_select %p89_p1, %s2015_s14, %s91_s19  }
   0x9   : > { %p2082_p5 = por %p102_p2, %p101_p0  ;;  %p2086_p6 = por %p108_p4, %p107_p3 }
   0xa   : > { %p1427_p7 = scmp.ge.s32.totalorder %s2019_s15, 1  ;;  %p142_p8 = scmp.lt.s32.totalorder %s2019_s15, 3 }
   0xc   : > { %p143_p9 = pnand %p1427_p7, %p142_p8 }
   0xd   : > { %v1828_v0 = vld [vmem:[%s2452_s1 + $0x40] sm:$0xff] (!%p143_p9)   ;;  %v1832_v4 = vld [vmem:[%s2452_s1 + $0x48] sm:$0xff] (!%p143_p9)   ;;  %v1836_v8 = vld [vmem:[%s2452_s1 + $0x50] sm:$0xff] (!%p143_p9)   ;;  %s1429_s9 = sshll.u32 (!%p143_p9), %s2065_s16, 4  ;;  %vm919_vm0 = vcmask (!%p143_p9), 130048   ;;  %s1550_s26 = sshll.u32 (!%p143_p9), %s2065_s16, 11 }
   0xe   : > { %146 = sbr.rel (%p143_p9) target bundleno = 387 (0x183), region = 32  ;;  %v1829_v1 = vld [vmem:[%s2452_s1 + $0xc0] sm:$0xff] (!%p143_p9)   ;;  %1551 = vmatprep.subr.bf16.mxu0 (!%p143_p9), %v1828_v0  ;;  %v1833_v5 = vld [vmem:[%s2452_s1 + $0xc8] sm:$0xff] (!%p143_p9)   ;;  %v1837_v9 = vld [vmem:[%s2452_s1 + $0xd0] sm:$0xff] (!%p143_p9)   ;;  %p168_p10 = scmp.lt.s32.totalorder (!%p143_p9), %s1429_s9, 31 }
   0xf   : > { %v1830_v2 = vld [vmem:[%s2452_s1] sm:$0xff] (!%p143_p9)   ;;  %1615 = vmatprep.subr.bf16.mxu1 (!%p143_p9), %v1829_v1  ;;  %v1834_v6 = vld [vmem:[%s2452_s1 + $0x8] sm:$0xff] (!%p143_p9)   ;;  %v1838_v10 = vld [vmem:[%s2452_s1 + $0x10] sm:$0xff] (!%p143_p9)   ;;  %s2402_s30 = scalar_lea.hbm (!%p143_p9), %s2454_s3, %s1550_s26  ;;  %s2021_s5 = smov (!%p143_p9), [#allocation2]  }
  0x10   : > { %v1831_v3 = vld [vmem:[%s2452_s1 + $0x80] sm:$0xff] (!%p143_p9)   ;;  %1552 = vmatpush3.bf16.msra.mxu0 (!%p143_p9), %v1830_v2  ;;  %v1835_v7 = vld [vmem:[%s2452_s1 + $0x88] sm:$0xff] (!%p143_p9)   ;;  %v1839_v11 = vld [vmem:[%s2452_s1 + $0x90] sm:$0xff] (!%p143_p9)  }
  0x11   : > { %1616 = vmatpush3.bf16.msra.mxu1 (!%p143_p9), %v1831_v3  ;;  %1553 = vmatprep.subr.bf16.mxu0 (!%p143_p9), %v1832_v4  ;;  %v1840_v12 = vld [vmem:[%s2452_s1 + $0x58] sm:$0xff] (!%p143_p9)   ;;  %v1844_v16 = vld [vmem:[%s2452_s1 + $0x60] sm:$0xff] (!%p143_p9)   ;;  %v1848_v20 = vld [vmem:[%s2452_s1 + $0x68] sm:$0xff] (!%p143_p9)  }
  0x12   : > { %1617 = vmatprep.subr.bf16.mxu1 (!%p143_p9), %v1833_v5  ;;  %v1841_v13 = vld [vmem:[%s2452_s1 + $0xd8] sm:$0xff] (!%p143_p9)   ;;  %v1845_v17 = vld [vmem:[%s2452_s1 + $0xe0] sm:$0xff] (!%p143_p9)   ;;  %v1849_v21 = vld [vmem:[%s2452_s1 + $0xe8] sm:$0xff] (!%p143_p9)  }
  0x13   : > { %v1842_v14 = vld [vmem:[%s2452_s1 + $0x18] sm:$0xff] (!%p143_p9)   ;;  %v1846_v18 = vld [vmem:[%s2452_s1 + $0x20] sm:$0xff] (!%p143_p9)   ;;  %v1850_v22 = vld [vmem:[%s2452_s1 + $0x28] sm:$0xff] (!%p143_p9)  }
  0x14   : > { %1554 = vmatpush3.bf16.msra.mxu0 (!%p143_p9), %v1834_v6  ;;  %v1843_v15 = vld [vmem:[%s2452_s1 + $0x98] sm:$0xff] (!%p143_p9)   ;;  %v1847_v19 = vld [vmem:[%s2452_s1 + $0xa0] sm:$0xff] (!%p143_p9)   ;;  %v1851_v23 = vld [vmem:[%s2452_s1 + $0xa8] sm:$0xff] (!%p143_p9)  }
  0x15   : > { %1618 = vmatpush3.bf16.msra.mxu1 %v1835_v7  ;;  %1555 = vmatprep.subr.bf16.mxu0 %v1836_v8  ;;  %s2462_s9 = smov (!%p168_p10, %s1429_s9), 31  ;;  %v1852_v24 = vld [vmem:[%s2452_s1 + $0x70] sm:$0xff]   ;;  %v1856_v28 = vld [vmem:[%s2452_s1 + $0x78] sm:$0xff]   ;;  %v1866_v36 = vld [vmem:[%s2452_s1 + $0x140] sm:$0xff]  }
  0x16   : > { %1619 = vmatprep.subr.bf16.mxu1 %v1837_v9  ;;  %v1853_v25 = vld [vmem:[%s2452_s1 + $0xf0] sm:$0xff]   ;;  %s1786_s24 = smul.u32 28, %s2462_s9  ;;  %v1857_v29 = vld [vmem:[%s2452_s1 + $0xf8] sm:$0xff]   ;;  %v1867_v37 = vld [vmem:[%s2452_s1 + $0x100] sm:$0xff]   ;;  %s1961_s9 = sshll.u32 %s2021_s5, 4  ;;  %s1962_s9 = int_to_ptr.vmem [resolvable:$false] %s1961_s9 }
  0x17   : > { %v1854_v26 = vld [vmem:[%s2452_s1 + $0x30] sm:$0xff]   ;;  %v1858_v30 = vld [vmem:[%s2452_s1 + $0x38] sm:$0xff]   ;;  %v1874_v42 = vld [vmem:[%s2452_s1 + $0x148] sm:$0xff]   ;;  %s1963_s6 = scalar_lea.vmem %s1962_s9, 4096 }
  0x18   : > { %1556 = vmatpush3.bf16.msra.mxu0 %v1838_v10  ;;  %v1855_v27 = vld [vmem:[%s2452_s1 + $0xb0] sm:$0xff]   ;;  %s2186_s7 = scalar_lea.vmem %s2451_s0, %s1786_s24  ;;  %v1859_v31 = vld [vmem:[%s2452_s1 + $0xb8] sm:$0xff]   ;;  %v1875_v43 = vld [vmem:[%s2452_s1 + $0x108] sm:$0xff]  }
  0x19   : > { %1620 = vmatpush3.bf16.msra.mxu1 %v1839_v11  ;;  %1557 = vmatprep.subr.bf16.mxu0 %v1840_v12  ;;  %v1860_v32 = vld [vmem:[%s2186_s7] ss:$28 sps:$4 sm:$0xff]   ;;  %v1863_v34 = vld [vmem:[%s2186_s7 + $0x8] ss:$28 sps:$4 sm:$0xff]   ;;  %v1872_v40 = vld [vmem:[%s2186_s7 + $0x38] ss:$28 sps:$4 sm:$0xff]  }
  0x1a   : > { %1621 = vmatprep.subr.bf16.mxu1 %v1841_v13  ;;  %v1862_v33 = vld [vmem:[%s2186_s7 + $0x4] ss:$28 sps:$4 sm:$0xff]   ;;  %v1865_v35 = vld [vmem:[%s2186_s7 + $0xc] ss:$28 sps:$4 sm:$0xff]   ;;  %v1868_v38 = vld [vmem:[%s2186_s7 + $0x3c] ss:$28 sps:$4 sm:$0xff]  }
  0x1b   : > { %976 = vmatprep.mubr.bf16.mxu0 %v1862_v33  ;;  %1073 = vmatprep.mubr.bf16.mxu1 %v1865_v35  ;;  %v1870_v39 = vld [vmem:[%s2186_s7 + $0x44] ss:$28 sps:$4 sm:$0xff]   ;;  %v1876_v44 = vld [vmem:[%s2186_s7 + $0x74] ss:$28 sps:$4 sm:$0xff]   ;;  %v1878_v45 = vld [vmem:[%s2186_s7 + $0x7c] ss:$28 sps:$4 sm:$0xff]  }
  0x1c   : > { %1558 = vmatpush3.bf16.msra.mxu0 %v1842_v14  ;;  %v1873_v41 = vld [vmem:[%s2186_s7 + $0x40] ss:$28 sps:$4 sm:$0xff]   ;;  %v1882_v46 = vld [vmem:[%s2452_s1 + $0x150] sm:$0xff]   ;;  %v1884_v50 = vld [vmem:[%s2186_s7 + $0xac] ss:$28 sps:$4 sm:$0xff]  }
  0x1d   : > { %1622 = vmatpush3.bf16.msra.mxu1 %v1843_v15  ;;  %1559 = vmatprep.subr.bf16.mxu0 %v1844_v16  ;;  %v1883_v47 = vld [vmem:[%s2452_s1 + $0x110] sm:$0xff]   ;;  %v1890_v52 = vld [vmem:[%s2452_s1 + $0x158] sm:$0xff]   ;;  %v1898_v54 = vld [vmem:[%s2452_s1 + $0x160] sm:$0xff]  }
  0x1e   : > { %1623 = vmatprep.subr.bf16.mxu1 %v1845_v17  ;;  %v1880_v48 = vld [vmem:[%s2186_s7 + $0x70] ss:$28 sps:$4 sm:$0xff]   ;;  %v1881_v49 = vld [vmem:[%s2186_s7 + $0x78] ss:$28 sps:$4 sm:$0xff]   ;;  %v1899_v55 = vld [vmem:[%s2452_s1 + $0x120] sm:$0xff]  }
  0x1f   : > { %v1886_v51 = vld [vmem:[%s2186_s7 + $0xb4] ss:$28 sps:$4 sm:$0xff]   ;;  %v1891_v53 = vld [vmem:[%s2452_s1 + $0x118] sm:$0xff]   ;;  %v1888_v56 = vld [vmem:[%s2186_s7 + $0xa8] ss:$28 sps:$4 sm:$0xff]  }
  0x20   : > { %1560 = vmatpush3.bf16.msra.mxu0 %v1846_v18  ;;  %v1889_v57 = vld [vmem:[%s2186_s7 + $0xb0] ss:$28 sps:$4 sm:$0xff]   ;;  %v1892_v58 = vld [vmem:[%s2186_s7 + $0xe4] ss:$28 sps:$4 sm:$0xff]   ;;  %v1900_v2 = vld [vmem:[%s2186_s7 + $0x11c] ss:$28 sps:$4 sm:$0xff]  }
  0x21   : > { %1624 = vmatpush3.bf16.msra.mxu1 %v1847_v19  ;;  %1561 = vmatprep.subr.bf16.mxu0 %v1848_v20  ;;  %v1894_v59 = vld [vmem:[%s2186_s7 + $0xec] ss:$28 sps:$4 sm:$0xff]   ;;  %v1896_v62 = vld [vmem:[%s2186_s7 + $0xe0] ss:$28 sps:$4 sm:$0xff]   ;;  %v1914_v0 = vld [vmem:[%s2452_s1 + $0x170] sm:$0xff]  }
  0x22   : > { %1625 = vmatprep.subr.bf16.mxu1 %v1849_v21  ;;  %v1906_v60 = vld [vmem:[%s2452_s1 + $0x168] sm:$0xff]   ;;  %v1915_v1 = vld [vmem:[%s2452_s1 + $0x130] sm:$0xff]   ;;  %v1902_v3 = vld [vmem:[%s2186_s7 + $0x124] ss:$28 sps:$4 sm:$0xff]  }
  0x23   : > { %v1907_v61 = vld [vmem:[%s2452_s1 + $0x128] sm:$0xff]   ;;  %v1922_v4 = vld [vmem:[%s2452_s1 + $0x178] sm:$0xff]   ;;  %v1930_v8 = vld [vmem:[%s2452_s1 + $0x180] sm:$0xff]  }
  0x24   : > { %1562 = vmatpush3.bf16.msra.mxu0 %v1850_v22  ;;  %v1897_v63 = vld [vmem:[%s2186_s7 + $0xe8] ss:$28 sps:$4 sm:$0xff]   ;;  %v1923_v5 = vld [vmem:[%s2452_s1 + $0x138] sm:$0xff]   ;;  %v1908_v9 = vld [vmem:[%s2186_s7 + $0x154] ss:$28 sps:$4 sm:$0xff]  }
  0x25   : > { %1626 = vmatpush3.bf16.msra.mxu1 %v1851_v23  ;;  %1563 = vmatprep.subr.bf16.mxu0 %v1852_v24  ;;  %v1904_v6 = vld [vmem:[%s2186_s7 + $0x118] ss:$28 sps:$4 sm:$0xff]   ;;  %v1905_v7 = vld [vmem:[%s2186_s7 + $0x120] ss:$28 sps:$4 sm:$0xff]   ;;  %v1912_v11 = vld [vmem:[%s2186_s7 + $0x150] ss:$28 sps:$4 sm:$0xff]  }
  0x26   : > { %1627 = vmatprep.subr.bf16.mxu1 %v1853_v25  ;;  %v1910_v10 = vld [vmem:[%s2186_s7 + $0x15c] ss:$28 sps:$4 sm:$0xff]   ;;  %v1916_v13 = vld [vmem:[%s2186_s7 + $0x18c] ss:$28 sps:$4 sm:$0xff]   ;;  %v1918_v14 = vld [vmem:[%s2186_s7 + $0x194] ss:$28 sps:$4 sm:$0xff]  }
  0x27   : > { %v1913_v12 = vld [vmem:[%s2186_s7 + $0x158] ss:$28 sps:$4 sm:$0xff]   ;;  %v1920_v15 = vld [vmem:[%s2186_s7 + $0x188] ss:$28 sps:$4 sm:$0xff]   ;;  %v1921_v16 = vld [vmem:[%s2186_s7 + $0x190] ss:$28 sps:$4 sm:$0xff]  }
  0x28   : > { %1564 = vmatpush3.bf16.msra.mxu0 %v1854_v26  ;;  %v1926_v17 = vld [vmem:[%s2186_s7 + $0x14] ss:$28 sps:$4 sm:$0xff]   ;;  %v1929_v18 = vld [vmem:[%s2186_s7 + $0x164] ss:$28 sps:$4 sm:$0xff]   ;;  %v1931_v21 = vld [vmem:[%s2186_s7 + $0x4c] ss:$28 sps:$4 sm:$0xff]  }
  0x29   : > { %1628 = vmatpush3.bf16.msra.mxu1 %v1855_v27  ;;  %1565 = vmatprep.subr.bf16.mxu0 %v1856_v28  ;;  %v1924_v19 = vld [vmem:[%s2186_s7 + $0x10] ss:$28 sps:$4 sm:$0xff]   ;;  %v1927_v20 = vld [vmem:[%s2186_s7 + $0x160] ss:$28 sps:$4 sm:$0xff]   ;;  %v1935_v23 = vld [vmem:[%s2186_s7 + $0x48] ss:$28 sps:$4 sm:$0xff]  }
  0x2a   : > { %1629 = vmatprep.subr.bf16.mxu1 %v1857_v29  ;;  %v1933_v22 = vld [vmem:[%s2186_s7 + $0x19c] ss:$28 sps:$4 sm:$0xff]   ;;  %v1937_v25 = vld [vmem:[%s2186_s7 + $0x84] ss:$28 sps:$4 sm:$0xff]   ;;  %v1941_v28 = vld [vmem:[%s2186_s7 + $0x50] ss:$28 sps:$4 sm:$0xff]  }
  0x2b   : > { %v1936_v24 = vld [vmem:[%s2186_s7 + $0x198] ss:$28 sps:$4 sm:$0xff]   ;;  %v1940_v27 = vld [vmem:[%s2186_s7 + $0x80] ss:$28 sps:$4 sm:$0xff]   ;;  %v1950_v35 = vld [vmem:[%s2186_s7 + $0xf0] ss:$28 sps:$4 sm:$0xff]  }
  0x2c   : > { %1566 = vmatpush3.bf16.msra.mxu0 %v1858_v30  ;;  %v1939_v26 = vld [vmem:[%s2186_s7 + $0x18] ss:$28 sps:$4 sm:$0xff]   ;;  %v1944_v30 = vld [vmem:[%s2186_s7 + $0x88] ss:$28 sps:$4 sm:$0xff]  }
  0x2d   : > { %1630 = vmatpush3.bf16.msra.mxu1 %v1859_v31  ;;  %1679 = vmatprep.subr.bf16.mxu0 %v1866_v36  ;;  %v1942_v29 = vld [vmem:[%s2186_s7 + $0xbc] ss:$28 sps:$4 sm:$0xff]   ;;  %v1947_v33 = vld [vmem:[%s2186_s7 + $0xf4] ss:$28 sps:$4 sm:$0xff]  }
  0x2e   : > { %1770 = vmatprep.subr.bf16.mxu1 %v1866_v36  ;;  %v1945_v31 = vld [vmem:[%s2186_s7 + $0xb8] ss:$28 sps:$4 sm:$0xff]   ;;  %v1951_v36 = vld [vmem:[%s2186_s7 + $0x130] ss:$28 sps:$4 sm:$0xff]  }
  0x2f   : > { %977 = vmatmul.mubr.bf16.vlgmr.msra.gmra.mrb[0].mxu0 %v1860_v32  ;;  %v1946_v32 = vld [vmem:[%s2186_s7 + $0xc0] ss:$28 sps:$4 sm:$0xff]  }
  0x30   : > { %1074 = vmatmul.mubr.bf16.vlgmr.msra.gmra.mrb[0].mxu1 %v1863_v34  ;;  %1680 = vmatpush3.bf16.msra.mxu0 %v1867_v37  ;;  %v1949_v34 = vld [vmem:[%s2186_s7 + $0xf8] ss:$28 sps:$4 sm:$0xff]  }
  0x31   : > { %1778 = vmatpush3.bf16.msra.mxu1 %v1867_v37  ;;  %984 = vmatprep.mubr.bf16.mxu0 %v1868_v38  ;;  %v1952_v37 = vld [vmem:[%s2186_s7 + $0x12c] ss:$28 sps:$4 sm:$0xff]  }
  0x32   : > { %1081 = vmatprep.mubr.bf16.mxu1 %v1870_v39  ;;  %1681 = vmatprep.subr.bf16.mxu0 %v1874_v42  ;;  %v1954_v38 = vld [vmem:[%s2186_s7 + $0x168] ss:$28 sps:$4 sm:$0xff]  }
  0x33   : > { %1771 = vmatprep.subr.bf16.mxu1 %v1874_v42  ;;  %v1955_v39 = vld [vmem:[%s2186_s7 + $0x128] ss:$28 sps:$4 sm:$0xff]   ;;  %v2312_v42 = vld [vmem:[%s2453_s2] ss:$0 sm:$0xff] }
  0x34   : > { %1682 = vmatpush3.bf16.msra.mxu0 %v1875_v43 }
  0x35   : > { %1779 = vmatpush3.bf16.msra.mxu1 %v1875_v43  ;;  %1683 = vmatprep.subr.bf16.mxu0 %v1882_v46 }
  0x36   : > { %1772 = vmatprep.subr.bf16.mxu1 %v1882_v46 }
  0x37   : > { %985 = vmatmul.mubr.bf16.gmra.mrb[4].mxu0 %v1872_v40  ;;  %v1956_v40 = vld [vmem:[%s2186_s7 + $0x1a0] ss:$28 sps:$4 sm:$0xff]   ;;  %s164_s7 = sand.u32 1, %s2011_s13  }
  0x38   : > { %1082 = vmatmul.mubr.bf16.gmra.mrb[4].mxu1 %v1873_v41  ;;  %992 = vmatprep.mubr.bf16.mxu0 %v1876_v44  ;;  %s1428_s24 = sshll.u32 %s164_s7, 7  ;;  %s2410_s16 = scalar_lea.sflag [#allocation3], %s164_s7 }
  0x39   : > { %1089 = vmatprep.mubr.bf16.mxu1 %v1878_v45  ;;  %1684 = vmatpush3.bf16.msra.mxu0 %v1883_v47  ;;  %s2369_s25 = scalar_lea.vmem [#allocation2], %s1428_s24 }
  0x3a   : > { %1780 = vmatpush3.bf16.msra.mxu1 %v1883_v47  ;;  %1685 = vmatprep.subr.bf16.mxu0 %v1890_v52  ;;  %s1362_s27 = sshll.u32 %s2369_s25, 4  ;;  %s2404_s27 = int_to_ptr.vmem [resolvable:$true] %s1362_s27 }
  0x3b   : > { %1773 = vmatprep.subr.bf16.mxu1 %v1890_v52  ;;  %s1957_s4 = scalar_lea.vmem %s2404_s27, 2048  ;;  %p1964_p0 = scmp.lt.s32.totalorder %s2404_s27, %s1962_s9 }
  0x3c   : > { %p1958_p11 = scmp.ne.s32.totalorder %s2404_s27, %s1957_s4  ;;  %p1965_p1 = scmp.lt.s32.totalorder %s1963_s6, %s1957_s4 }
  0x3d   : > { %1686 = vmatpush3.bf16.msra.mxu0 %v1891_v53 }
  0x3e   : > { %1781 = vmatpush3.bf16.msra.mxu1 %v1891_v53  ;;  %1687 = vmatprep.subr.bf16.mxu0 %v1898_v54  ;;  %p1959_p12 = pnand %p1958_p11, %p2082_p5  ;;  %p1966_p2 = por %p1965_p1, %p1964_p0 }
  0x3f   : > { %993 = vmatmul.mubr.bf16.gmra.mrb[8].mxu0 %v1880_v48  ;;  %1774 = vmatprep.subr.bf16.mxu1 %v1898_v54 }
  0x40   : > { %1090 = vmatmul.mubr.bf16.gmra.mrb[8].mxu1 %v1881_v49  ;;  %1000 = vmatprep.mubr.bf16.mxu0 %v1884_v50  ;;  %p1960_p13 = pneg %p1959_p12 }
  0x41   : > { %1097 = vmatprep.mubr.bf16.mxu1 %v1886_v51  ;;  %1688 = vmatpush3.bf16.msra.mxu0 %v1899_v55 }
  0x42   : > { %1782 = vmatpush3.bf16.msra.mxu1 %v1899_v55  ;;  %1689 = vmatprep.subr.bf16.mxu0 %v1906_v60  ;;  %p1967_p3 = pnand %p1966_p2, %p1960_p13 }
  0x43   : > { %1775 = vmatprep.subr.bf16.mxu1 %v1906_v60 }
  0x45   : > { %1690 = vmatpush3.bf16.msra.mxu0 %v1907_v61 }
  0x46   : > { %1783 = vmatpush3.bf16.msra.mxu1 %v1907_v61  ;;  %1691 = vmatprep.subr.bf16.mxu0 %v1914_v0 }
  0x47   : > { %1001 = vmatmul.mubr.bf16.gmra.mrb[12].mxu0 %v1888_v56  ;;  %1776 = vmatprep.subr.bf16.mxu1 %v1914_v0 }
  0x48   : > { %1098 = vmatmul.mubr.bf16.gmra.mrb[12].mxu1 %v1889_v57  ;;  %1008 = vmatprep.mubr.bf16.mxu0 %v1892_v58 }
  0x49   : > { %1105 = vmatprep.mubr.bf16.mxu1 %v1894_v59  ;;  %1692 = vmatpush3.bf16.msra.mxu0 %v1915_v1 }
  0x4a   : > { %1784 = vmatpush3.bf16.msra.mxu1 %v1915_v1  ;;  %1693 = vmatprep.subr.bf16.mxu0 %v1922_v4 }
  0x4b   : > { %1777 = vmatprep.subr.bf16.mxu1 %v1922_v4 }
  0x4d   : > { %1694 = vmatpush3.bf16.msra.mxu0 %v1923_v5 }
  0x4e   : > { %1785 = vmatpush3.bf16.msra.mxu1 %v1923_v5 }
  0x4f   : > { %1009 = vmatmul.mubr.bf16.gmra.mrb[16].mxu0 %v1896_v62  ;;  %1752 = vmatprep.subr.bf16.mxu1 %v1930_v8 }
  0x50   : > { %1106 = vmatmul.mubr.bf16.gmra.mrb[16].mxu1 %v1897_v63  ;;  %1016 = vmatprep.mubr.bf16.mxu0 %v1900_v2 }
  0x51   : > { %1113 = vmatprep.mubr.bf16.mxu1 %v1902_v3 }
  0x57   : > { %1017 = vmatmul.mubr.bf16.gmra.mrb[20].mxu0 %v1904_v6 }
  0x58   : > { %1114 = vmatmul.mubr.bf16.gmra.mrb[20].mxu1 %v1905_v7  ;;  %1024 = vmatprep.mubr.bf16.mxu0 %v1908_v9 }
  0x59   : > { %1121 = vmatprep.mubr.bf16.mxu1 %v1910_v10 }
  0x5f   : > { %1025 = vmatmul.mubr.bf16.gmra.mrb[24].mxu0 %v1912_v11 }
  0x60   : > { %1122 = vmatmul.mubr.bf16.gmra.mrb[24].mxu1 %v1913_v12  ;;  %1032 = vmatprep.mubr.bf16.mxu0 %v1916_v13 }
  0x61   : > { %1129 = vmatprep.mubr.bf16.mxu1 %v1918_v14 }
  0x67   : > { %1033 = vmatmul.mubr.bf16.gmra.mrb[28].mxu0 %v1920_v15 }
  0x68   : > { %1130 = vmatmul.mubr.bf16.gmra.mrb[28].mxu1 %v1921_v16  ;;  %1170 = vmatprep.mubr.bf16.mxu0 %v1926_v17 }
  0x69   : > { %1218 = vmatprep.mubr.bf16.mxu1 %v1929_v18 }
  0x6f   : > { %1171 = vmatmul.mubr.bf16.vlgmr.msra.gmra.mrb[32].mxu0 %v1924_v19 }
  0x70   : > { %1219 = vmatmul.mubr.bf16.vlgmr.msra.gmra.mrb[32].mxu1 %v1927_v20  ;;  %1178 = vmatprep.mubr.bf16.mxu0 %v1931_v21 }
  0x71   : > { %1753 = vmatpush3.bf16.msra.mxu1 %v1930_v8  ;;  %1226 = vmatprep.mubr.bf16.mxu1 %v1933_v22 }
  0x77   : > { %1179 = vmatmul.mubr.bf16.gmra.mrb[36].mxu0 %v1935_v23 }
  0x78   : > { %1227 = vmatmul.mubr.bf16.gmra.mrb[36].mxu1 %v1936_v24  ;;  %1186 = vmatprep.mubr.bf16.mxu0 %v1937_v25 }
  0x79   : > { %1754 = vmatprep.mubr.msk.bf16.mxu1 %vm919_vm0, %v1939_v26 }
  0x7f   : > { %1187 = vmatmul.mubr.bf16.gmra.mrb[40].mxu0 %v1940_v27 }
  0x80   : > { %1755 = vmatmul.mubr.msk.bf16.vlgmr.msra.gmra.mrb[40].mxu1 %vm919_vm0, %v1941_v28  ;;  %1194 = vmatprep.mubr.bf16.mxu0 %v1942_v29 }
  0x81   : > { %1758 = vmatprep.mubr.msk.bf16.mxu1 %vm919_vm0, %v1944_v30 }
  0x87   : > { %1195 = vmatmul.mubr.bf16.gmra.mrb[44].mxu0 %v1945_v31 }
  0x88   : > { %1759 = vmatmul.mubr.msk.bf16.gmra.mrb[44].mxu1 %vm919_vm0, %v1946_v32  ;;  %1202 = vmatprep.mubr.bf16.mxu0 %v1947_v33 }
  0x89   : > { %1762 = vmatprep.mubr.msk.bf16.mxu1 %vm919_vm0, %v1949_v34 }
  0x8f   : > { %1203 = vmatmul.mubr.bf16.gmra.mrb[48].mxu0 %v1950_v35 }
  0x90   : > { %1763 = vmatmul.mubr.msk.bf16.gmra.mrb[48].mxu1 %vm919_vm0, %v1951_v36  ;;  %1210 = vmatprep.mubr.bf16.mxu0 %v1952_v37 }
  0x91   : > { %1766 = vmatprep.mubr.msk.bf16.mxu1 %vm919_vm0, %v1954_v38 }
  0x97   : > { %1211 = vmatmul.mubr.bf16.gmra.mrb[52].mxu0 %v1955_v39 }
  0x98   : > { %1767 = vmatmul.mubr.msk.bf16.gmra.mrb[52].mxu1 %vm919_vm0, %v1956_v40 }
 0x102   : > { %v1567_v41 = vpop.f32.mrb[0].mxu0 }
 0x103   : > { %v1568_v43 = vpop.f32.mrb[1].mxu0  ;;  %v1631_v44 = vpop.f32.mrb[0].mxu1 }
 0x104   : > { %v1569_v45 = vadd.f32 %v1568_v43, %v1567_v41  ;;  %v1570_v46 = vpop.f32.mrb[2].mxu0  ;;  %v1632_v47 = vpop.f32.mrb[1].mxu1 }
 0x105   : > { %v1571_v48 = vpop.f32.mrb[3].mxu0  ;;  %v1633_v49 = vadd.f32 %v1632_v47, %v1631_v44  ;;  %v1634_v50 = vpop.f32.mrb[2].mxu1 }
 0x106   : > { %v979_v51 = vadd.f32 %v1569_v45, %v2312_v42  ;;  %v1572_v52 = vadd.f32 %v1571_v48, %v1570_v46  ;;  %v1635_v53 = vpop.f32.mrb[3].mxu1 }
 0x107   : > { %v1636_v54 = vadd.f32 %v1635_v53, %v1634_v50 }
 0x108   : > { %v982_v55 = vadd.f32 %v1572_v52, %v2312_v42  ;;  %v2316_v56 = vadd.f32 %v1633_v49, %v979_v51 }
 0x10a   : > { %v2318_v57 = vadd.f32 %v1636_v54, %v982_v55  ;;  %v1573_v58 = vpop.f32.mrb[4].mxu0 }
 0x10b   : > { %v1574_v59 = vpop.f32.mrb[5].mxu0  ;;  %v1637_v60 = vpop.f32.mrb[4].mxu1 }
 0x10c   : > { %v1575_v61 = vadd.f32 %v1574_v59, %v1573_v58  ;;  %v1576_v62 = vpop.f32.mrb[6].mxu0  ;;  %v1638_v63 = vpop.f32.mrb[5].mxu1 }
 0x10d   : > { %v1577_v0 = vpop.f32.mrb[7].mxu0  ;;  %v1639_v1 = vadd.f32 %v1638_v63, %v1637_v60  ;;  %v1640_v2 = vpop.f32.mrb[6].mxu1 }
 0x10e   : > { %v987_v3 = vadd.f32 %v1575_v61, %v2312_v42  ;;  %v1578_v4 = vadd.f32 %v1577_v0, %v1576_v62  ;;  %v1641_v5 = vpop.f32.mrb[7].mxu1 }
 0x10f   : > { %v1642_v6 = vadd.f32 %v1641_v5, %v1640_v2 }
 0x110   : > { %v990_v7 = vadd.f32 %v1578_v4, %v2312_v42  ;;  %v2322_v8 = vadd.f32 %v1639_v1, %v987_v3 }
 0x112   : > { %v2324_v9 = vadd.f32 %v1642_v6, %v990_v7  ;;  %v1579_v10 = vpop.f32.mrb[8].mxu0 }
 0x113   : > { %v1580_v11 = vpop.f32.mrb[9].mxu0  ;;  %v1643_v12 = vpop.f32.mrb[8].mxu1 }
 0x114   : > { %v1581_v13 = vadd.f32 %v1580_v11, %v1579_v10  ;;  %v1582_v14 = vpop.f32.mrb[10].mxu0  ;;  %v1644_v15 = vpop.f32.mrb[9].mxu1 }
 0x115   : > { %v1583_v16 = vpop.f32.mrb[11].mxu0  ;;  %v1645_v17 = vadd.f32 %v1644_v15, %v1643_v12  ;;  %v1646_v18 = vpop.f32.mrb[10].mxu1 }
 0x116   : > { %v995_v19 = vadd.f32 %v1581_v13, %v2312_v42  ;;  %v1584_v20 = vadd.f32 %v1583_v16, %v1582_v14  ;;  %v1647_v21 = vpop.f32.mrb[11].mxu1 }
 0x117   : > { %v1648_v22 = vadd.f32 %v1647_v21, %v1646_v18 }
 0x118   : > { %v998_v23 = vadd.f32 %v1584_v20, %v2312_v42  ;;  %v2328_v24 = vadd.f32 %v1645_v17, %v995_v19 }
 0x11a   : > { %v2330_v25 = vadd.f32 %v1648_v22, %v998_v23  ;;  %v1585_v26 = vpop.f32.mrb[12].mxu0 }
 0x11b   : > { %v1586_v27 = vpop.f32.mrb[13].mxu0  ;;  %v1649_v28 = vpop.f32.mrb[12].mxu1 }
 0x11c   : > { %v1587_v29 = vadd.f32 %v1586_v27, %v1585_v26  ;;  %v1588_v30 = vpop.f32.mrb[14].mxu0  ;;  %v1650_v31 = vpop.f32.mrb[13].mxu1 }
 0x11d   : > { %v1589_v32 = vpop.f32.mrb[15].mxu0  ;;  %v1651_v33 = vadd.f32 %v1650_v31, %v1649_v28  ;;  %v1652_v34 = vpop.f32.mrb[14].mxu1 }
 0x11e   : > { %v1003_v35 = vadd.f32 %v1587_v29, %v2312_v42  ;;  %v1590_v36 = vadd.f32 %v1589_v32, %v1588_v30  ;;  %v1653_v37 = vpop.f32.mrb[15].mxu1 }
 0x11f   : > { %v1654_v38 = vadd.f32 %v1653_v37, %v1652_v34 }
 0x120   : > { %v1006_v39 = vadd.f32 %v1590_v36, %v2312_v42  ;;  %v2334_v40 = vadd.f32 %v1651_v33, %v1003_v35 }
 0x122   : > { %v2336_v41 = vadd.f32 %v1654_v38, %v1006_v39  ;;  %v1591_v43 = vpop.f32.mrb[16].mxu0 }
 0x123   : > { %v1592_v44 = vpop.f32.mrb[17].mxu0  ;;  %v1655_v45 = vpop.f32.mrb[16].mxu1 }
 0x124   : > { %v1593_v46 = vadd.f32 %v1592_v44, %v1591_v43  ;;  %v1594_v47 = vpop.f32.mrb[18].mxu0  ;;  %v1656_v48 = vpop.f32.mrb[17].mxu1 }
 0x125   : > { %v1595_v49 = vpop.f32.mrb[19].mxu0  ;;  %v1657_v50 = vadd.f32 %v1656_v48, %v1655_v45  ;;  %v1658_v51 = vpop.f32.mrb[18].mxu1 }
 0x126   : > { %v1011_v52 = vadd.f32 %v1593_v46, %v2312_v42  ;;  %v1596_v53 = vadd.f32 %v1595_v49, %v1594_v47  ;;  %v1659_v54 = vpop.f32.mrb[19].mxu1 }
 0x127   : > { %v1660_v55 = vadd.f32 %v1659_v54, %v1658_v51 }
 0x128   : > { %v1014_v58 = vadd.f32 %v1596_v53, %v2312_v42  ;;  %v2340_v59 = vadd.f32 %v1657_v50, %v1011_v52 }
 0x12a   : > { %v2342_v60 = vadd.f32 %v1660_v55, %v1014_v58  ;;  %v1597_v61 = vpop.f32.mrb[20].mxu0 }
 0x12b   : > { %v1598_v62 = vpop.f32.mrb[21].mxu0  ;;  %v1661_v63 = vpop.f32.mrb[20].mxu1 }
 0x12c   : > { %v1599_v0 = vadd.f32 %v1598_v62, %v1597_v61  ;;  %v1600_v1 = vpop.f32.mrb[22].mxu0  ;;  %v1662_v2 = vpop.f32.mrb[21].mxu1 }
 0x12d   : > { %v1601_v3 = vpop.f32.mrb[23].mxu0  ;;  %v1663_v4 = vadd.f32 %v1662_v2, %v1661_v63  ;;  %v1664_v5 = vpop.f32.mrb[22].mxu1 }
 0x12e   : > { %v1019_v6 = vadd.f32 %v1599_v0, %v2312_v42  ;;  %v1602_v7 = vadd.f32 %v1601_v3, %v1600_v1  ;;  %v1665_v10 = vpop.f32.mrb[23].mxu1 }
 0x12f   : > { %v1666_v11 = vadd.f32 %v1665_v10, %v1664_v5 }
 0x130   : > { %v1022_v12 = vadd.f32 %v1602_v7, %v2312_v42  ;;  %v2346_v13 = vadd.f32 %v1663_v4, %v1019_v6 }
 0x132   : > { %v2348_v14 = vadd.f32 %v1666_v11, %v1022_v12  ;;  %v1603_v15 = vpop.f32.mrb[24].mxu0 }
 0x133   : > { %v1604_v16 = vpop.f32.mrb[25].mxu0  ;;  %v1667_v17 = vpop.f32.mrb[24].mxu1 }
 0x134   : > { %v1605_v18 = vadd.f32 %v1604_v16, %v1603_v15  ;;  %v1606_v19 = vpop.f32.mrb[26].mxu0  ;;  %v1668_v20 = vpop.f32.mrb[25].mxu1 }
 0x135   : > { %v1607_v21 = vpop.f32.mrb[27].mxu0  ;;  %v1669_v22 = vadd.f32 %v1668_v20, %v1667_v17  ;;  %v1670_v23 = vpop.f32.mrb[26].mxu1 }
 0x136   : > { %v1027_v26 = vadd.f32 %v1605_v18, %v2312_v42  ;;  %v1608_v27 = vadd.f32 %v1607_v21, %v1606_v19  ;;  %v1671_v28 = vpop.f32.mrb[27].mxu1 }
 0x137   : > { %v1672_v29 = vadd.f32 %v1671_v28, %v1670_v23 }
 0x138   : > { %v1030_v30 = vadd.f32 %v1608_v27, %v2312_v42  ;;  %v1124_v31 = vadd.f32 %v1669_v22, %v1027_v26 }
 0x13a   : > { %v1127_v32 = vadd.f32 %v1672_v29, %v1030_v30  ;;  %v1609_v33 = vpop.f32.mrb[28].mxu0 }
 0x13b   : > { %v1610_v34 = vpop.f32.mrb[29].mxu0  ;;  %v1673_v35 = vpop.f32.mrb[28].mxu1 }
 0x13c   : > { %v1611_v36 = vadd.f32 %v1610_v34, %v1609_v33  ;;  %v1612_v37 = vpop.f32.mrb[30].mxu0  ;;  %v1674_v38 = vpop.f32.mrb[29].mxu1 }
 0x13d   : > { %v1613_v39 = vpop.f32.mrb[31].mxu0  ;;  %v1675_v43 = vadd.f32 %v1674_v38, %v1673_v35  ;;  %v1676_v44 = vpop.f32.mrb[30].mxu1 }
 0x13e   : > { %v1035_v45 = vadd.f32 %v1611_v36, %v2312_v42  ;;  %v1614_v46 = vadd.f32 %v1613_v39, %v1612_v37  ;;  %v1677_v47 = vpop.f32.mrb[31].mxu1 }
 0x13f   : > { %v1678_v48 = vadd.f32 %v1677_v47, %v1676_v44 }
 0x140   : > { %v1038_v49 = vadd.f32 %v1614_v46, %v2312_v42  ;;  %v1132_v50 = vadd.f32 %v1675_v43, %v1035_v45 }
 0x142   : > { %v1135_v51 = vadd.f32 %v1678_v48, %v1038_v49  ;;  %v1695_v52 = vpop.f32.mrb[32].mxu0 }
 0x143   : > { %v1731_v53 = vpop.f32.mrb[32].mxu1  ;;  %v1696_v54 = vpop.f32.mrb[33].mxu0 }
 0x144   : > { %v1697_v55 = vadd.f32 %v1696_v54, %v1695_v52  ;;  %v1732_v58 = vpop.f32.mrb[33].mxu1  ;;  %v1698_v61 = vpop.f32.mrb[34].mxu0 }
 0x145   : > { %v1733_v62 = vadd.f32 %v1732_v58, %v1731_v53  ;;  %v1734_v63 = vpop.f32.mrb[34].mxu1  ;;  %v1699_v0 = vpop.f32.mrb[35].mxu0 }
 0x146   : > { %v1700_v1 = vadd.f32 %v1699_v0, %v1698_v61  ;;  %v1735_v2 = vpop.f32.mrb[35].mxu1  ;;  %v1173_v3 = vadd.f32 %v1697_v55, %v2316_v56 }
 0x147   : > { %v1736_v4 = vadd.f32 %v1735_v2, %v1734_v63  ;;  %v2355_v5 = vadd.f32 %v1733_v62, %v1124_v31 }
 0x148   : > { %v1176_v42 = vadd.f32 %v1700_v1, %v2318_v57 }
 0x149   : > { %v2358_v6 = vadd.f32 %v1736_v4, %v1127_v32 }
 0x14a   : > { %v1701_v7 = vpop.f32.mrb[36].mxu0 }
 0x14b   : > { %v1737_v10 = vpop.f32.mrb[36].mxu1  ;;  %v1702_v11 = vpop.f32.mrb[37].mxu0 }
 0x14c   : > { %v1703_v12 = vadd.f32 %v1702_v11, %v1701_v7  ;;  %v1738_v15 = vpop.f32.mrb[37].mxu1  ;;  %v1704_v16 = vpop.f32.mrb[38].mxu0 }
 0x14d   : > { %v1739_v17 = vadd.f32 %v1738_v15, %v1737_v10  ;;  %v1740_v18 = vpop.f32.mrb[38].mxu1  ;;  %v1705_v19 = vpop.f32.mrb[39].mxu0 }
 0x14e   : > { %v1706_v20 = vadd.f32 %v1705_v19, %v1704_v16  ;;  %v1741_v56 = vpop.f32.mrb[39].mxu1  ;;  %v1181_v21 = vadd.f32 %v1703_v12, %v2322_v8 }
 0x14f   : > { %v1742_v22 = vadd.f32 %v1741_v56, %v1740_v18  ;;  %v2362_v23 = vadd.f32 %v1739_v17, %v1132_v50 }
 0x150   : > { %v1184_v57 = vadd.f32 %v1706_v20, %v2324_v9 }
 0x151   : > { %v2367_v26 = vadd.f32 %v1742_v22, %v1135_v51 }
 0x152   : > { %v1707_v27 = vpop.f32.mrb[40].mxu0 }
 0x153   : > { %v1756_v28 = vpop.f32.mrb[40].mxu1  ;;  %v1708_v29 = vpop.f32.mrb[41].mxu0 }
 0x154   : > { %v1278_v30 = vadd.f32 %v1756_v28, %v1181_v21  ;;  %v1709_v31 = vadd.f32 %v1708_v29, %v1707_v27  ;;  %v1269_v32 = vpop.f32.mrb[41].mxu1  ;;  %v1710_v33 = vpop.f32.mrb[42].mxu0 }
 0x155   : > { %v1270_v34 = vadd.f32 %v1269_v32, %v1173_v3  ;;  %v1757_v35 = vpop.f32.mrb[42].mxu1  ;;  %v1711_v36 = vpop.f32.mrb[43].mxu0 }
 0x156   : > { %1334 = vst [vmem:[%s2369_s25 + $0x10] sm:$0xff] %v1278_v30  ;;  %v1281_v8 = vadd.f32 %v1757_v35, %v1184_v57  ;;  %v1712_v9 = vadd.f32 %v1711_v36, %v1710_v33  ;;  %v1272_v37 = vpop.f32.mrb[43].mxu1  ;;  %v1189_v38 = vadd.f32 %v1709_v31, %v2328_v24 }
 0x157   : > { %1332 = vst [vmem:[%s2369_s25] sm:$0xff] %v1270_v34  ;;  %v1273_v39 = vadd.f32 %v1272_v37, %v1176_v42 }
 0x158   : > { %1335 = vst [vmem:[%s2369_s25 + $0x18] sm:$0xff] %v1281_v8  ;;  %v1192_v43 = vadd.f32 %v1712_v9, %v2330_v25 }
 0x159   : > { %1333 = vst [vmem:[%s2369_s25 + $0x8] sm:$0xff] %v1273_v39 }
 0x15a   : > { %v1713_v44 = vpop.f32.mrb[44].mxu0 }
 0x15b   : > { %v1760_v45 = vpop.f32.mrb[44].mxu1  ;;  %v1714_v46 = vpop.f32.mrb[45].mxu0 }
 0x15c   : > { %v1715_v47 = vadd.f32 %v1714_v46, %v1713_v44  ;;  %v1285_v48 = vpop.f32.mrb[45].mxu1  ;;  %v1716_v49 = vpop.f32.mrb[46].mxu0 }
 0x15d   : > { %v1286_v50 = vadd.f32 %v1285_v48, %v1189_v38  ;;  %v1761_v51 = vpop.f32.mrb[46].mxu1  ;;  %v1717_v52 = vpop.f32.mrb[47].mxu0 }
 0x15e   : > { %v1197_v24 = vadd.f32 %v1715_v47, %v2334_v40  ;;  %v1718_v53 = vadd.f32 %v1717_v52, %v1716_v49  ;;  %v1288_v54 = vpop.f32.mrb[47].mxu1 }
 0x15f   : > { %1336 = vst [vmem:[%s2369_s25 + $0x20] sm:$0xff] %v1286_v50  ;;  %v1289_v55 = vadd.f32 %v1288_v54, %v1192_v43 }
 0x160   : > { %v1294_v25 = vadd.f32 %v1760_v45, %v1197_v24  ;;  %v1200_v58 = vadd.f32 %v1718_v53, %v2336_v41 }
 0x161   : > { %1337 = vst [vmem:[%s2369_s25 + $0x28] sm:$0xff] %v1289_v55 }
 0x162   : > { %1338 = vst [vmem:[%s2369_s25 + $0x30] sm:$0xff] %v1294_v25  ;;  %v1297_v61 = vadd.f32 %v1761_v51, %v1200_v58  ;;  %v1719_v62 = vpop.f32.mrb[48].mxu0 }
 0x163   : > { %v1720_v63 = vpop.f32.mrb[49].mxu0  ;;  %v1764_v0 = vpop.f32.mrb[48].mxu1 }
 0x164   : > { %1339 = vst [vmem:[%s2369_s25 + $0x38] sm:$0xff] %v1297_v61  ;;  %v1721_v1 = vadd.f32 %v1720_v63, %v1719_v62  ;;  %v1722_v2 = vpop.f32.mrb[50].mxu0  ;;  %v1301_v3 = vpop.f32.mrb[49].mxu1 }
 0x165   : > { %v1723_v40 = vpop.f32.mrb[51].mxu0  ;;  %v1765_v4 = vpop.f32.mrb[50].mxu1 }
 0x166   : > { %v1724_v42 = vadd.f32 %v1723_v40, %v1722_v2  ;;  %v1205_v7 = vadd.f32 %v1721_v1, %v2340_v59  ;;  %v1304_v10 = vpop.f32.mrb[51].mxu1 }
 0x168   : > { %v1302_v41 = vadd.f32 %v1301_v3, %v1205_v7  ;;  %v1208_v11 = vadd.f32 %v1724_v42, %v2342_v60 }
 0x16a   : > { %1340 = vst [vmem:[%s2369_s25 + $0x40] sm:$0xff] %v1302_v41  ;;  %v1305_v12 = vadd.f32 %v1304_v10, %v1208_v11  ;;  %v1725_v15 = vpop.f32.mrb[52].mxu0 }
 0x16b   : > { %v1768_v16 = vpop.f32.mrb[52].mxu1  ;;  %v1726_v17 = vpop.f32.mrb[53].mxu0 }
 0x16c   : > { %1341 = vst [vmem:[%s2369_s25 + $0x48] sm:$0xff] %v1305_v12  ;;  %v1326_v18 = vadd.f32 %v1768_v16, %v2362_v23  ;;  %v1727_v19 = vadd.f32 %v1726_v17, %v1725_v15  ;;  %v1317_v20 = vpop.f32.mrb[53].mxu1  ;;  %v1728_v59 = vpop.f32.mrb[54].mxu0 }
 0x16d   : > { %v1318_v56 = vadd.f32 %v1317_v20, %v2355_v5  ;;  %v1769_v21 = vpop.f32.mrb[54].mxu1  ;;  %v1729_v60 = vpop.f32.mrb[55].mxu0 }
 0x16e   : > { %1346 = vst [vmem:[%s2369_s25 + $0x70] sm:$0xff] %v1326_v18  ;;  %v1213_v22 = vadd.f32 %v1727_v19, %v2346_v13  ;;  %v1329_v57 = vadd.f32 %v1769_v21, %v2367_v26  ;;  %v1730_v27 = vadd.f32 %v1729_v60, %v1728_v59  ;;  %v1320_v28 = vpop.f32.mrb[55].mxu1 }
 0x16f   : > { %1344 = vst [vmem:[%s2369_s25 + $0x60] sm:$0xff] %v1318_v56  ;;  %v1321_v23 = vadd.f32 %v1320_v28, %v2358_v6 }
 0x170   : > { %v1310_v29 = vadd.f32 %v1764_v0, %v1213_v22  ;;  %1347 = vst [vmem:[%s2369_s25 + $0x78] sm:$0xff] %v1329_v57  ;;  %v1216_v5 = vadd.f32 %v1730_v27, %v2348_v14 }
 0x171   : > { %1345 = vst [vmem:[%s2369_s25 + $0x68] sm:$0xff] %v1321_v23 }
 0x172   : > { %1342 = vst [vmem:[%s2369_s25 + $0x50] sm:$0xff] %v1310_v29  ;;  %v1313_v13 = vadd.f32 %v1765_v4, %v1216_v5 }
 0x174   : > { %1343 = vst [vmem:[%s2369_s25 + $0x58] sm:$0xff] %v1313_v13 }
 0x175   : > { %1970 = shalt.err (!%p1967_p3)
}
 0x176   : > { %s1971_s8 = scalar_lea.hbm %s2402_s30, 2048  ;;  %s1975_s17 = scalar_lea.hbm %s2454_s3, 4096 }
 0x177   : > { %p1972_p4 = scmp.ne.s32.totalorder %s2402_s30, %s1971_s8  ;;  %p1976_p9 = scmp.lt.u32.totalorder %s2402_s30, %s2454_s3 }
 0x178   : > { %p1977_p10 = scmp.lt.u32.totalorder %s1975_s17, %s1971_s8  ;;  %p1979_p12 = scmp.lt.u32.totalorder %s1971_s8, %s2402_s30 }
 0x179   : > { %p1973_p7 = pnand %p1972_p4, %p2082_p5 }
 0x17a   : > { %p1978_p11 = por %p1977_p10, %p1976_p9 }
 0x17b   : > { %p1974_p8 = pneg %p1973_p7 }
 0x17c   : > { %p1980_p13 = por %p1979_p12, %p1978_p11 }
 0x17e   : > { %p1981_p0 = pnand %p1980_p13, %p1974_p8 }
 0x180   : > { %1984 = shalt.err (!%p1981_p0)
}
 0x181   : > { %s2022_s7 = smov 128   ;;  %s2023_s24 = smov 8  }
 0x182   : > { %1787 = dma.vmem_to_hbm [thread:$0]  (%p2082_p5), %s2404_s27, 2048, %s2402_s30, %s2410_s16, %s2022_s7, %s2022_s7, %s2023_s24  }
 0x183 PF: > { %p1793_p1 = scmp.ge.s32.totalorder %s2019_s15, 2  ;;  %s1377_s25 = sand.u32 1, %s2007_s12  }
 0x184   : > { %s1378_s26 = scalar_lea.sflag [#allocation3], %s1377_s25 }
 0x185   : > { %p1790_p2 = pnand %p1793_p1, %p2086_p6 }
 0x187   : > { %2002 = dma.done.wait (!%p1790_p2), %s1378_s26, 2048  }
 0x188   : > { %2004 = vsyncadd (!%p1790_p2), %s1378_s26, 4294965248  ;;  %p13_p3 = scmp.ge.s32.totalorder %s2069_s18, 4   ;;  %s2457_s12 = smov %s2011_s13 }
 0x189   : > { %s2458_s13 = smov %s2015_s14  ;;  %s2459_s14 = smov %s2080_s21 }
 0x18a   : > { %s2460_s15 = smov %s2069_s18  ;;  %15 = sbr.rel (!%p13_p3) target bundleno = 3 (0x3), region = 67 }
 0x191   :  { %1383 = vsyncpa [#allocation3], 1 }
 0x192   :  { %1385 = vsyncpa [#allocation3 + $0x1], 1 }

</bundles_post_ra>
